<compile_context>
chip_gen: v7x
topology: tpu7x:2x2x1
jax: 0.10.0
libtpu: 0.0.40
codegen_flags: <defaults>
</compile_context>

<pallas_src>
import functools

import jax
import jax.numpy as jnp
from jax.experimental import pallas as pl
from jax.experimental.pallas import tpu as pltpu

POSITIVE_EMOTIONS = [11, 16, 6, 8, 3, 1, 28, 13, 31, 17, 24, 0, 27]
NEGATIVE_EMOTIONS = [9, 4, 2, 14, 30, 29, 25, 15, 10, 23, 19, 18, 21, 7, 20, 5,
                     26, 12, 22]
N_POS = len(POSITIVE_EMOTIONS)      # 13
N_NEG = len(NEGATIVE_EMOTIONS)      # 19
N_DZ = N_POS + N_NEG                # 32  (fused Dense_z head width)

# constant-slab row layout (rows; lane width = W, see pack_vae_params)
#   row 0                    : b_h
#   row 1                    : b_heads  [b_mu_p | b_mu_n | b_lv_p | b_lv_p]
#   row 2                    : b_dz     [b_dz_p | b_dz_n]
#   rows 3        .. 3+H     : w_h
#   rows 3+H      .. 3+2H    : w_heads  [w_mu_p | w_mu_n | w_lv_p | w_lv_p]
#   rows 3+2H     .. 3+2H+2O : w_dz block-diag [[w_dz_p, 0], [0, w_dz_n]]
#   rows 3+2H+2O  .. +N_DZ   : emb block-diag  [[emb_p, 0], [0, emb_n]]


def vae_sampling_kernel(x_ref, const_ref, eps_ref, ispos_ref,
                        em_out_ref, heads_out_ref, *, H, O, E):
    B = x_ref.shape[0]
    O2 = 2 * O
    ROW_WH = 3
    ROW_WHEADS = 3 + H
    ROW_WDZ = 3 + 2 * H
    ROW_EMB = 3 + 2 * H + O2

    x = x_ref[...]

    # static slices of the single constant slab (zero runtime cost)
    b_h = const_ref[0:1, 0:H]
    b_heads = const_ref[1:2, 0:4 * O]
    b_dz = const_ref[2:3, 0:N_DZ]
    w_h = const_ref[ROW_WH:ROW_WH + H, 0:H]
    w_heads = const_ref[ROW_WHEADS:ROW_WHEADS + H, 0:4 * O]
    w_dz = const_ref[ROW_WDZ:ROW_WDZ + O2, 0:N_DZ]
    emb = const_ref[ROW_EMB:ROW_EMB + N_DZ, 0:2 * E]

    # prior(): h1 = relu(h_prior(x))
    h1 = jnp.maximum(
        jnp.dot(x, w_h, preferred_element_type=jnp.float32) + b_h, 0.0)

    # fused prior heads, lane-dense 4*O wide: [mu_p | mu_n | lv_p | lv_p]
    heads = jnp.dot(h1, w_heads, preferred_element_type=jnp.float32) + b_heads
    heads_out_ref[...] = heads                         # aligned 128-lane store

    # reparameterize both branches at once (eps slab = [eps_p | eps_n]);
    # lv_both == [lv_p | lv_p]: reproduces the PyTorch prior() logvar bug.
    mu_both = heads[:, 0:O2]
    lv_both = heads[:, O2:2 * O2]
    z = mu_both + eps_ref[...] * jnp.exp(0.5 * lv_both)            # (B, 2O)

    # fused Dense_z_prior_{positive,negative}: block-diagonal (2O, 32) weight
    logits = jnp.dot(z, w_dz, preferred_element_type=jnp.float32) + b_dz

    # segmented softmax: cols [0, N_POS) positive branch, rest negative
    col = jax.lax.broadcasted_iota(jnp.int32, (B, N_DZ), 1)
    is_p_col = col < N_POS
    neg_inf = jnp.float32(-jnp.inf)
    max_p = jnp.max(jnp.where(is_p_col, logits, neg_inf), axis=-1, keepdims=True)
    max_n = jnp.max(jnp.where(is_p_col, neg_inf, logits), axis=-1, keepdims=True)
    ex = jnp.exp(logits - jnp.where(is_p_col, max_p, max_n))
    sum_p = jnp.sum(jnp.where(is_p_col, ex, 0.0), axis=-1, keepdims=True)
    sum_n = jnp.sum(jnp.where(is_p_col, 0.0, ex), axis=-1, keepdims=True)
    probs = ex / jnp.where(is_p_col, sum_p, sum_n)     # exact division

    # one matmul against block-diag embeddings -> [emotions_p | emotions_n]
    emotions = jnp.dot(probs, emb, preferred_element_type=jnp.float32)  # (B,2E)
    em_p = emotions[:, 0:E]
    em_n = emotions[:, E:2 * E]

    is_pos = ispos_ref[...] > 0.5                                      # (B, 1)
    mimic = jnp.where(is_pos, em_p, em_n)
    nonmimic = jnp.where(is_pos, em_n, em_p)
    em_out_ref[...] = jnp.concatenate([mimic, nonmimic], axis=-1)      # (B, 2E)


def pack_vae_params(params, emb_table):
    """One-time packing of all parameter-derived constants (hoisted out of
    the per-call path).  Returns {"const": (rows, W) f32, "is_pos_table": (N,)}."""
    H = params["w_h"].shape[0]
    O = params["w_mu_p"].shape[1]
    E = emb_table.shape[-1]
    W = max(128, H, 4 * O, 2 * E, N_DZ)

    def pad_lanes(a):
        return jnp.pad(a.astype(jnp.float32), ((0, 0), (0, W - a.shape[1])))

    pos_idx = jnp.asarray(POSITIVE_EMOTIONS, jnp.int32)
    neg_idx = jnp.asarray(NEGATIVE_EMOTIONS, jnp.int32)

    emb_bd = jnp.zeros((N_DZ, 2 * E), jnp.float32)
    emb_bd = emb_bd.at[:N_POS, :E].set(emb_table[pos_idx])
    emb_bd = emb_bd.at[N_POS:, E:].set(emb_table[neg_idx])

    w_heads = jnp.concatenate([params["w_mu_p"], params["w_mu_n"],
                               params["w_lv_p"], params["w_lv_p"]], axis=1)
    b_heads = jnp.concatenate([params["b_mu_p"], params["b_mu_n"],
                               params["b_lv_p"], params["b_lv_p"]], axis=1)

    w_dz_bd = jnp.zeros((2 * O, N_DZ), jnp.float32)
    w_dz_bd = w_dz_bd.at[:O, :N_POS].set(params["w_dz_p"])
    w_dz_bd = w_dz_bd.at[O:, N_POS:].set(params["w_dz_n"])
    b_dz = jnp.concatenate([params["b_dz_p"], params["b_dz_n"]], axis=1)

    const = jnp.concatenate([
        pad_lanes(params["b_h"]),     # row 0
        pad_lanes(b_heads),           # row 1
        pad_lanes(b_dz),              # row 2
        pad_lanes(params["w_h"]),     # rows 3 : 3+H
        pad_lanes(w_heads),           # rows 3+H : 3+2H
        pad_lanes(w_dz_bd),           # rows 3+2H : 3+2H+2O
        pad_lanes(emb_bd),            # rows 3+2H+2O : +N_DZ
    ], axis=0)

    is_pos_table = jnp.zeros((emb_table.shape[0],), jnp.float32)
    is_pos_table = is_pos_table.at[pos_idx].set(1.0)
    return {"const": const, "is_pos_table": is_pos_table}


def vae_sampling_forward(const_slab, is_pos_table, q_h, e, eps, *,
                         out_dim, emb_dim):
    """q_h: (B,H) f32; e: (B,) int32 emotion ids; eps: (B, 2*out_dim) noise."""
    B, H = q_h.shape
    O, E = out_dim, emb_dim

    # only per-call glue: one tiny table gather (replaces jnp.isin per call)
    is_pos = is_pos_table[e].reshape(B, 1)

    vmem = pl.BlockSpec(memory_space=pltpu.MemorySpace.VMEM)
    kernel = functools.partial(vae_sampling_kernel, H=H, O=O, E=E)

    flops = 2 * B * (H * H + H * 4 * O + 2 * O * N_DZ + N_DZ * 2 * E)
    transcendentals = B * (2 * O + N_DZ)
    bytes_accessed = 4 * (B * H + const_slab.size + B * 2 * O + B
                          + B * 2 * E + B * 4 * O)

    em_out, heads_out = pl.pallas_call(
        kernel,
        out_shape=(jax.ShapeDtypeStruct((B, 2 * E), jnp.float32),
                   jax.ShapeDtypeStruct((B, 4 * O), jnp.float32)),
        in_specs=[vmem, vmem, vmem, vmem],
        out_specs=(vmem, vmem),
        cost_estimate=pl.CostEstimate(flops=flops,
                                      transcendentals=transcendentals,
                                      bytes_accessed=bytes_accessed),
    )(q_h, const_slab, eps, is_pos)

    mimic = em_out[:, 0:E]
    nonmimic = em_out[:, E:2 * E]
    mu_p = heads_out[:, 0:O]
    mu_n = heads_out[:, O:2 * O]
    logvar_p = heads_out[:, 2 * O:3 * O]
    # logvar_n returned == logvar_p (matches the PyTorch prior() behaviour).
    return mimic, nonmimic, mu_p, logvar_p, mu_n, logvar_p


def vae_sampling_reference(q_h, e, emb_table, params, eps_p, eps_n):
    """Pure-JAX reference of the eval forward path (same prior() bug)."""
    pos_idx = jnp.asarray(POSITIVE_EMOTIONS, jnp.int32)
    neg_idx = jnp.asarray(NEGATIVE_EMOTIONS, jnp.int32)
    h1 = jax.nn.relu(q_h @ params["w_h"] + params["b_h"])
    mu_p = h1 @ params["w_mu_p"] + params["b_mu_p"]
    lv_p = h1 @ params["w_lv_p"] + params["b_lv_p"]
    mu_n = h1 @ params["w_mu_n"] + params["b_mu_n"]
    z_p = mu_p + eps_p * jnp.exp(0.5 * lv_p)
    z_n = mu_n + eps_n * jnp.exp(0.5 * lv_p)
    prob_p = jax.nn.softmax(z_p @ params["w_dz_p"] + params["b_dz_p"], axis=-1)
    prob_n = jax.nn.softmax(z_n @ params["w_dz_n"] + params["b_dz_n"], axis=-1)
    em_p = prob_p @ emb_table[pos_idx]
    em_n = prob_n @ emb_table[neg_idx]
    is_pos = jnp.isin(e, pos_idx).reshape(-1, 1)
    mimic = jnp.where(is_pos, em_p, em_n)
    nonmimic = jnp.where(is_pos, em_n, em_p)
    return mimic, nonmimic, mu_p, lv_p, mu_n, lv_p


def init_params(key, hidden_dim, out_dim):
    """Deterministic synthetic parameters. Weights stored as (in, out)."""
    keys = jax.random.split(key, 6)

    def lin(k, din, dout):
        kw, kb = jax.random.split(k)
        scale = 1.0 / jnp.sqrt(din)
        w = jax.random.uniform(kw, (din, dout), jnp.float32, -scale, scale)
        b = jax.random.uniform(kb, (1, dout), jnp.float32, -scale, scale)
        return w, b

    p = {}
    p["w_h"], p["b_h"] = lin(keys[0], hidden_dim, hidden_dim)
    p["w_mu_p"], p["b_mu_p"] = lin(keys[1], hidden_dim, out_dim)
    p["w_lv_p"], p["b_lv_p"] = lin(keys[2], hidden_dim, out_dim)
    p["w_mu_n"], p["b_mu_n"] = lin(keys[3], hidden_dim, out_dim)
    # logvar_prior_negative exists in the module but prior() discards it (bug);
    # its weights never influence forward(), so they are not materialized.
    p["w_dz_p"], p["b_dz_p"] = lin(keys[4], out_dim, N_POS)
    p["w_dz_n"], p["b_dz_n"] = lin(keys[5], out_dim, N_NEG)
    return p


if __name__ == "__main__":
    B = 8
    hidden_dim = 32
    out_dim = 32
    emb_dim = 32
    num_emotions = 32

    key = jax.random.PRNGKey(0)
    k_qh, k_e, k_emb, k_par, k_eps = jax.random.split(key, 5)

    q_h = jax.random.normal(k_qh, (B, hidden_dim), jnp.float32)
    e = jax.random.randint(k_e, (B,), 0, num_emotions, jnp.int32)
    emb_table = jax.random.normal(k_emb, (num_emotions, emb_dim), jnp.float32)
    params = init_params(k_par, hidden_dim, out_dim)
    # explicit noise for reparameterize; single (B, 2O) slab = [eps_p | eps_n]
    eps = jax.random.normal(k_eps, (B, 2 * out_dim), jnp.float32)

    # one-time packing (hoisted out of the per-call path)
    packed = pack_vae_params(params, emb_table)
    packed = {k: jax.block_until_ready(v) for k, v in packed.items()}

    fwd = jax.jit(functools.partial(vae_sampling_forward,
                                    out_dim=out_dim, emb_dim=emb_dim))
    outs = jax.block_until_ready(
        fwd(packed["const"], packed["is_pos_table"], q_h, e, eps))

    eps_p, eps_n = eps[:, :out_dim], eps[:, out_dim:]
    refs = jax.block_until_ready(
        vae_sampling_reference(q_h, e, emb_table, params, eps_p, eps_n))

    names = ["mimic", "nonmimic", "mu_p", "logvar_p", "mu_n", "logvar_n"]
    for name, got, want in zip(names, outs, refs):
        assert got.shape == want.shape, (name, got.shape, want.shape)
        err = float(jnp.max(jnp.abs(got - want)))
        assert err < 1e-4, (name, err)

    print("KERNEL_OK")
</pallas_src>

<mosaic_0001>
module attributes {stable_mosaic.version = 11 : i64} {
  func.func @vae_sampling_kernel(%arg0: memref<8x32xf32, #tpu.memory_space<vmem>>, %arg1: memref<163x128xf32, #tpu.memory_space<vmem>>, %arg2: memref<8x64xf32, #tpu.memory_space<vmem>>, %arg3: memref<8x1xf32, #tpu.memory_space<vmem>>, %arg4: memref<8x64xf32, #tpu.memory_space<vmem>>, %arg5: memref<8x128xf32, #tpu.memory_space<vmem>>) attributes {dimension_semantics = [], scalar_prefetch = 0 : i64, scratch_operands = 0 : i64, tpu.core_type = #tpu.core_type<tc>} {
    %c0 = arith.constant 0 : index
    %c0_0 = arith.constant 0 : index
    %0 = vector.load %arg0[%c0, %c0_0] : memref<8x32xf32, #tpu.memory_space<vmem>>, vector<8x32xf32>
    %c0_1 = arith.constant 0 : index
    %c0_2 = arith.constant 0 : index
    %1 = vector.load %arg1[%c0_1, %c0_2] : memref<163x128xf32, #tpu.memory_space<vmem>>, vector<1x32xf32>
    %c1 = arith.constant 1 : index
    %c0_3 = arith.constant 0 : index
    %2 = vector.load %arg1[%c1, %c0_3] : memref<163x128xf32, #tpu.memory_space<vmem>>, vector<1x128xf32>
    %c2 = arith.constant 2 : index
    %c0_4 = arith.constant 0 : index
    %3 = vector.load %arg1[%c2, %c0_4] : memref<163x128xf32, #tpu.memory_space<vmem>>, vector<1x32xf32>
    %c3 = arith.constant 3 : index
    %c0_5 = arith.constant 0 : index
    %4 = vector.load %arg1[%c3, %c0_5] : memref<163x128xf32, #tpu.memory_space<vmem>>, vector<32x32xf32>
    %c35 = arith.constant 35 : index
    %c0_6 = arith.constant 0 : index
    %5 = vector.load %arg1[%c35, %c0_6] : memref<163x128xf32, #tpu.memory_space<vmem>>, vector<32x128xf32>
    %c67 = arith.constant 67 : index
    %c0_7 = arith.constant 0 : index
    %6 = vector.load %arg1[%c67, %c0_7] : memref<163x128xf32, #tpu.memory_space<vmem>>, vector<64x32xf32>
    %c131 = arith.constant 131 : index
    %c0_8 = arith.constant 0 : index
    %7 = vector.load %arg1[%c131, %c0_8] : memref<163x128xf32, #tpu.memory_space<vmem>>, vector<32x64xf32>
    %cst = arith.constant dense<0.000000e+00> : vector<8x32xf32>
    %8 = tpu.matmul %0, %4, %cst {dimension_numbers = #tpu.dot_dimension_numbers<[1], [0], [0], [1], [0, 0, 1, 1], [], []>} : vector<8x32xf32>, vector<32x32xf32>, vector<8x32xf32> -> vector<8x32xf32>
    %9 = vector.broadcast %1 : vector<1x32xf32> to vector<8x32xf32>
    %10 = arith.addf %8, %9 : vector<8x32xf32>
    %cst_9 = arith.constant 0.000000e+00 : f32
    %11 = vector.broadcast %cst_9 : f32 to vector<8x32xf32>
    %12 = arith.maximumf %10, %11 : vector<8x32xf32>
    %cst_10 = arith.constant dense<0.000000e+00> : vector<8x128xf32>
    %13 = tpu.matmul %12, %5, %cst_10 {dimension_numbers = #tpu.dot_dimension_numbers<[1], [0], [0], [1], [0, 0, 1, 1], [], []>} : vector<8x32xf32>, vector<32x128xf32>, vector<8x128xf32> -> vector<8x128xf32>
    %14 = vector.broadcast %2 : vector<1x128xf32> to vector<8x128xf32>
    %15 = arith.addf %13, %14 : vector<8x128xf32>
    %c0_11 = arith.constant 0 : index
    %c0_12 = arith.constant 0 : index
    %16 = vector.load %arg5[%c0_11, %c0_12] : memref<8x128xf32, #tpu.memory_space<vmem>>, vector<8x128xf32>
    tpu.vector_store %arg5[%c0_11, %c0_12], %15 {strides = array<i32>} : memref<8x128xf32, #tpu.memory_space<vmem>>, vector<8x128xf32>,
    %17 = vector.extract_strided_slice %15 {offsets = [0, 0], sizes = [8, 64], strides = [1, 1]} : vector<8x128xf32> to vector<8x64xf32>
    %18 = vector.extract_strided_slice %15 {offsets = [0, 64], sizes = [8, 64], strides = [1, 1]} : vector<8x128xf32> to vector<8x64xf32>
    %c0_13 = arith.constant 0 : index
    %c0_14 = arith.constant 0 : index
    %19 = vector.load %arg2[%c0_13, %c0_14] : memref<8x64xf32, #tpu.memory_space<vmem>>, vector<8x64xf32>
    %cst_15 = arith.constant 5.000000e-01 : f32
    %20 = vector.broadcast %cst_15 : f32 to vector<8x64xf32>
    %21 = arith.mulf %20, %18 : vector<8x64xf32>
    %22 = math.exp %21 : vector<8x64xf32>
    %23 = arith.mulf %19, %22 : vector<8x64xf32>
    %24 = arith.addf %17, %23 : vector<8x64xf32>
    %cst_16 = arith.constant dense<0.000000e+00> : vector<8x32xf32>
    %25 = tpu.matmul %24, %6, %cst_16 {dimension_numbers = #tpu.dot_dimension_numbers<[1], [0], [0], [1], [0, 0, 1, 1], [], []>} : vector<8x64xf32>, vector<64x32xf32>, vector<8x32xf32> -> vector<8x32xf32>
    %26 = vector.broadcast %3 : vector<1x32xf32> to vector<8x32xf32>
    %27 = arith.addf %25, %26 : vector<8x32xf32>
    %28 = tpu.iota {dimensions = array<i32: 1>} : vector<8x32xi32>
    %c13_i32 = arith.constant 13 : i32
    %29 = vector.broadcast %c13_i32 : i32 to vector<8x32xi32>
    %30 = arith.cmpi slt, %28, %29 : vector<8x32xi32>
    %cst_17 = arith.constant 0xFF800000 : f32
    %31 = vector.broadcast %cst_17 : f32 to vector<8x32xf32>
    %32 = arith.select %30, %27, %31 : vector<8x32xi1>, vector<8x32xf32>
    %cst_18 = arith.constant dense<0xFF800000> : vector<8xf32>
    %33 = vector.multi_reduction <maximumf>, %32, %cst_18 [1] : vector<8x32xf32> to vector<8xf32>
    %34 = vector.shape_cast %33 : vector<8xf32> to vector<8x1xf32>
    %cst_19 = arith.constant 0xFF800000 : f32
    %35 = vector.broadcast %cst_19 : f32 to vector<8x32xf32>
    %36 = arith.select %30, %35, %27 : vector<8x32xi1>, vector<8x32xf32>
    %cst_20 = arith.constant dense<0xFF800000> : vector<8xf32>
    %37 = vector.multi_reduction <maximumf>, %36, %cst_20 [1] : vector<8x32xf32> to vector<8xf32>
    %38 = vector.shape_cast %37 : vector<8xf32> to vector<8x1xf32>
    %39 = vector.shape_cast %34 : vector<8x1xf32> to vector<8x1xf32>
    %40 = vector.broadcast %39 : vector<8x1xf32> to vector<8x32xf32>
    %41 = vector.shape_cast %38 : vector<8x1xf32> to vector<8x1xf32>
    %42 = vector.broadcast %41 : vector<8x1xf32> to vector<8x32xf32>
    %43 = arith.select %30, %40, %42 : vector<8x32xi1>, vector<8x32xf32>
    %44 = arith.subf %27, %43 : vector<8x32xf32>
    %45 = math.exp %44 : vector<8x32xf32>
    %cst_21 = arith.constant 0.000000e+00 : f32
    %46 = vector.broadcast %cst_21 : f32 to vector<8x32xf32>
    %47 = arith.select %30, %45, %46 : vector<8x32xi1>, vector<8x32xf32>
    %cst_22 = arith.constant dense<0.000000e+00> : vector<8xf32>
    %48 = vector.multi_reduction <add>, %47, %cst_22 [1] : vector<8x32xf32> to vector<8xf32>
    %49 = vector.shape_cast %48 : vector<8xf32> to vector<8x1xf32>
    %cst_23 = arith.constant 0.000000e+00 : f32
    %50 = vector.broadcast %cst_23 : f32 to vector<8x32xf32>
    %51 = arith.select %30, %50, %45 : vector<8x32xi1>, vector<8x32xf32>
    %cst_24 = arith.constant dense<0.000000e+00> : vector<8xf32>
    %52 = vector.multi_reduction <add>, %51, %cst_24 [1] : vector<8x32xf32> to vector<8xf32>
    %53 = vector.shape_cast %52 : vector<8xf32> to vector<8x1xf32>
    %54 = vector.shape_cast %49 : vector<8x1xf32> to vector<8x1xf32>
    %55 = vector.broadcast %54 : vector<8x1xf32> to vector<8x32xf32>
    %56 = vector.shape_cast %53 : vector<8x1xf32> to vector<8x1xf32>
    %57 = vector.broadcast %56 : vector<8x1xf32> to vector<8x32xf32>
    %58 = arith.select %30, %55, %57 : vector<8x32xi1>, vector<8x32xf32>
    %59 = arith.divf %45, %58 : vector<8x32xf32>
    %cst_25 = arith.constant dense<0.000000e+00> : vector<8x64xf32>
    %60 = tpu.matmul %59, %7, %cst_25 {dimension_numbers = #tpu.dot_dimension_numbers<[1], [0], [0], [1], [0, 0, 1, 1], [], []>} : vector<8x32xf32>, vector<32x64xf32>, vector<8x64xf32> -> vector<8x64xf32>
    %61 = vector.extract_strided_slice %60 {offsets = [0, 0], sizes = [8, 32], strides = [1, 1]} : vector<8x64xf32> to vector<8x32xf32>
    %62 = vector.extract_strided_slice %60 {offsets = [0, 32], sizes = [8, 32], strides = [1, 1]} : vector<8x64xf32> to vector<8x32xf32>
    %c0_26 = arith.constant 0 : index
    %c0_27 = arith.constant 0 : index
    %63 = vector.load %arg3[%c0_26, %c0_27] : memref<8x1xf32, #tpu.memory_space<vmem>>, vector<8x1xf32>
    %cst_28 = arith.constant 5.000000e-01 : f32
    %64 = vector.broadcast %cst_28 : f32 to vector<8x1xf32>
    %65 = arith.cmpf ogt, %63, %64 : vector<8x1xf32>
    %66 = vector.shape_cast %65 : vector<8x1xi1> to vector<8x1xi1>
    %67 = vector.broadcast %66 : vector<8x1xi1> to vector<8x32xi1>
    %68 = arith.select %67, %61, %62 : vector<8x32xi1>, vector<8x32xf32>
    %69 = vector.shape_cast %65 : vector<8x1xi1> to vector<8x1xi1>
    %70 = vector.broadcast %69 : vector<8x1xi1> to vector<8x32xi1>
    %71 = arith.select %70, %62, %61 : vector<8x32xi1>, vector<8x32xf32>
    %72 = tpu.concatenate %68, %71 in 1 : vector<8x32xf32>, vector<8x32xf32> -> vector<8x64xf32>
    %c0_29 = arith.constant 0 : index
    %c0_30 = arith.constant 0 : index
    %73 = vector.load %arg4[%c0_29, %c0_30] : memref<8x64xf32, #tpu.memory_space<vmem>>, vector<8x64xf32>
    tpu.vector_store %arg4[%c0_29, %c0_30], %72 {strides = array<i32>} : memref<8x64xf32, #tpu.memory_space<vmem>>, vector<8x64xf32>,
    return
  }
}

</mosaic_0001>

<bundles_post_ra>
// kernel: vae_sampling_forward.1
= control target key start
LH: loop header
LB: loop body
LE: loop exit
PB: predicated region body
PF: predicated region fallthrough
CT: control target
= control target key end

     0   :  { %v541_v0 = vmov 0.0|0.0   ;;  %vm542_vm0 = vmmov 0   ;;  %v543_v4 = vmov 0.0   ;;  %vm47_vm1 = vcmask 261120   ;;  %s544_s7 = smov 64   ;;  %s547_s19 = smov 32   ;;  %s692_s1 = inlined_call_operand.vmem [shape: f32[163,128], index: 1, kind: input, shape index: {}]   ;;  %s693_s0 = inlined_call_operand.vmem [shape: f32[8,32], index: 0, kind: input, shape index: {}]   ;;  %s694_s5 = inlined_call_operand.vmem [shape: f32[8,128], index: 5, kind: output, shape index: {1}]   ;;  %s695_s2 = inlined_call_operand.vmem [shape: f32[8,64], index: 2, kind: input, shape index: {}]   ;;  %s696_s3 = inlined_call_operand.vmem [shape: f32[8,1], index: 3, kind: input, shape index: {}]   ;;  %s697_s4 = inlined_call_operand.vmem [shape: f32[8,64], index: 4, kind: output, shape index: {0}]  }
   0x1   :  { %496 = vmatprep.subr.bf16.mxu0 %v541_v0  ;;  %v23_v1 = vld [vmem:[%s692_s1 + $0x3] sm:$0xff]  ;;  %v24_v2 = vld [vmem:[%s692_s1 + $0xb] sm:$0xff]  ;;  %v25_v3 = vld [vmem:[%s692_s1 + $0x13] sm:$0xff]  ;;  %452 = vmatprep.mubr.msk.f32.mxu0 %vm542_vm0, %v543_v4  ;;  %vm214_vm2 = vcmask 523264   ;;  %v288_v43 = vlaneseq }
   0x2   :  { %v497_v5 = vpack.c.bf16 %v24_v2, %v23_v1  ;;  %v26_v6 = vld [vmem:[%s692_s1 + $0x1b] sm:$0xff]  ;;  %502 = vmatprep.subr.bf16.mxu1 %v541_v0  ;;  %v27_v7 = vld [vmem:[%s692_s1 + $0x23] sm:$0xff]  ;;  %463 = vmatprep.mubr.msk.f32.mxu1 %vm542_vm0, %v543_v4  ;;  %v28_v8 = vld [vmem:[%s692_s1 + $0x2b] sm:$0xff] }
   0x3   :  { %v500_v9 = vpack.c.bf16 %v26_v6, %v25_v3  ;;  %v503_v10 = vpack.c.bf16 %v28_v8, %v27_v7  ;;  %v19_v11 = vld [vmem:[%s693_s0] sm:$0xff]  ;;  %v29_v12 = vld [vmem:[%s692_s1 + $0x33] sm:$0xff]  ;;  %v32_v21 = vld [vmem:[%s692_s1 + $0x4b] sm:$0xff]  ;;  %v289_v44 = vand.u32 127, %v288_v43  ;;  %v545_v6 = vmov 0  }
   0x4   :  { %498 = vmatpush3.bf16.msra.mxu0 %v497_v5  ;;  %v30_v13 = vld [vmem:[%s692_s1 + $0x3b] sm:$0xff]  ;;  %v31_v20 = vld [vmem:[%s692_s1 + $0x43] sm:$0xff]  ;;  %v33_v22 = vld [vmem:[%s692_s1 + $0x53] sm:$0xff]  ;;  %533 = vset.pattern.permute.xlu1 %v545_v6 }
   0x5   :  { %499 = vmatprep.subr.bf16.mxu0 %v541_v0  ;;  %504 = vmatpush3.bf16.msra.mxu1 %v503_v10  ;;  %v506_v14 = vpack.c.bf16 %v30_v13, %v29_v12  ;;  %v413_v15 = vld [vmem:[%s692_s1] ss:$0 sm:$0xff]  ;;  %v509_v23 = vpack.c.bf16 %v32_v21, %v31_v20  ;;  %v35_v26 = vld [vmem:[%s692_s1 + $0x63] sm:$0xff]  ;;  %v36_v27 = vld [vmem:[%s692_s1 + $0x6b] sm:$0xff]  ;;  %vm290_vm3 = vcmp.lt.s32.totalorder %v289_v44, 13 }
   0x6   :  { %505 = vmatprep.subr.bf16.mxu1 %v541_v0  ;;  %v34_v24 = vld [vmem:[%s692_s1 + $0x5b] sm:$0xff]  ;;  %v515_v28 = vpack.c.bf16 %v36_v27, %v35_v26  ;;  %v37_v34 = vld [vmem:[%s692_s1 + $0x73] sm:$0xff]  ;;  %v39_v63 = vld [vmem:[%s692_s1 + $0x83] sm:$0xff]  ;;  %534 = vset.pattern.permute.xlu0 %v545_v6 }
   0x7   :  { %v512_v25 = vpack.c.bf16 %v34_v24, %v33_v22  ;;  %v415_v29 = vld [vmem:[%s692_s1 + $0x1] ss:$0 sm:$0xff]  ;;  %v417_v45 = vld [vmem:[%s692_s1 + $0x2] ss:$0 sm:$0xff]  ;;  %v40_v1 = vld [vmem:[%s692_s1 + $0x8b] sm:$0xff] }
   0x8   :  { %501 = vmatpush3.bf16.msra.mxu0 %v500_v9  ;;  %v38_v35 = vld [vmem:[%s692_s1 + $0x7b] sm:$0xff]  ;;  %v41_v2 = vld [vmem:[%s692_s1 + $0x93] sm:$0xff]  ;;  %v521_v3 = vpack.c.bf16 %v40_v1, %v39_v63 }
   0x9   :  { %508 = vmatprep.subr.bf16.mxu0 %v541_v0  ;;  %507 = vmatpush3.bf16.msra.mxu1 %v506_v14  ;;  %v518_v36 = vpack.c.bf16 %v38_v35, %v37_v34  ;;  %v200_v39 = vld [vmem:[%s695_s2] sm:$0xff] }
   0xa   :  { %520 = vmatprep.subr.bf16.mxu1 %v541_v0  ;;  %v387_v7 = vld [vmem:[%s696_s3] sm:$0xff] }
   0xb   :  { %453 = vmatmul.mubr.msk.f32.vlgmr.msra.gmra.mrb[0].mxu0 %vm47_vm1, %v19_v11  ;;  %vm388_vm4 = vcmp.gt.f32.partialorder %v387_v7, 0.5 }
   0xc   :  { %482 = vmatprep.mubr.msk.f32.mxu0 %vm542_vm0, %v543_v4  ;;  %510 = vmatpush3.bf16.msra.mxu0 %v509_v23  ;;  %v389_v8 = vsel %vm388_vm4, 1, %v545_v6 }
   0xd   :  { %511 = vmatprep.subr.bf16.mxu0 %v541_v0 }
  0x10   :  { %513 = vmatpush3.bf16.msra.mxu0 %v512_v25 }
  0x11   :  { %514 = vmatprep.subr.bf16.mxu0 %v541_v0 }
  0x14   :  { %516 = vmatpush3.bf16.msra.mxu0 %v515_v28 }
  0x15   :  { %517 = vmatprep.subr.bf16.mxu0 %v541_v0 }
  0x18   :  { %519 = vmatpush3.bf16.msra.mxu0 %v518_v36 }
  0xde   :  { %v117_v16 = vpop.f32.mrb[0].mxu0 }
  0xdf   :  { %v118_v17 = vadd.f32 %v413_v15, %v117_v16  ;;  %v454_v18 = vpop.f32.mrb[1].mxu0 }
  0xe1   :  { %v121_v19 = vmax.f32 %v118_v17, 0.0 }
  0xe3   :  { %464 = vmatmul.mubr.msk.f32.vlgmr.msra.gmra.mrb[0].mxu1 %vm47_vm1, %v121_v19 }
  0xe4   :  { %493 = vmatprep.mubr.msk.f32.mxu1 %vm542_vm0, %v543_v4  ;;  %v42_v4 = vld [vmem:[%s692_s1 + $0x9b] sm:$0xff]  ;;  %522 = vmatpush3.bf16.msra.mxu1 %v521_v3  ;;  %s546_s1 = smov 96  }
  0xe5   :  { %v524_v5 = vpack.c.bf16 %v42_v4, %v41_v2  ;;  %523 = vmatprep.subr.bf16.mxu1 %v541_v0 }
  0xe8   :  { %525 = vmatpush3.bf16.msra.mxu1 %v524_v5 }
 0x1b6   :  { %v195_v30 = vpop.f32.mrb[0].mxu1 }
 0x1b7   :  { %v196_v31 = vadd.f32 %v415_v29, %v195_v30  ;;  %v465_v32 = vpop.f32.mrb[1].mxu1 }
 0x1b9   :  { %199 = vst [vmem:[%s694_s5] sm:$0xff] %v196_v31  ;;  %v201_v33 = vmul.f32 0.5, %v196_v31 }
 0x1bb   :  { %v202_v37 = vmul.f32 1.442695, %v201_v33 }
 0x1bd   :  { %535 = vpow2.f32 %v202_v37 }
 0x1c7   :  { %v536_v38 = vpop.eup %535 }
 0x1c8   :  { %205 = vrot.lane.b32.xlu0 %v536_v38, %s544_s7 }
 0x23a   :  { %v206_v40 = vpop.permute.xlu0 %205 }
 0x23b   :  { %v208_v41 = vmul.f32 %v206_v40, %v200_v39 }
 0x23d   :  { %v209_v42 = vadd.f32 %v208_v41, %v196_v31 }
 0x23f   :  { %483 = vmatmul.mubr.msk.f32.vlgmr.msra.gmra.mrb[2].mxu0 %vm214_vm2, %v209_v42 }
 0x312   :  { %v284_v46 = vpop.f32.mrb[2].mxu0 }
 0x313   :  { %v285_v47 = vadd.f32 %v417_v45, %v284_v46  ;;  %v484_v48 = vpop.f32.mrb[3].mxu0 }
 0x315   :  { %v295_v49 = vsel %vm290_vm3, -inf, %v285_v47  ;;  %v291_v50 = vsel %vm290_vm3, %v285_v47, -inf }
 0x316   :  { %v296_v51 = vsel %vm47_vm1, %v295_v49, -inf  ;;  %v292_v52 = vsel %vm47_vm1, %v291_v50, -inf }
 0x317   :  { %297 = vmax.xlane.f32.xlu1 %v296_v51  ;;  %293 = vmax.xlane.f32.xlu0 %v292_v52 }
 0x3a4   :  { %v298_v53 = vpop.xlane.xlu1 %297  ;;  %v294_v54 = vpop.xlane.xlu0 %293 }
 0x3a5   :  { %v299_v55 = vsel %vm290_vm3, %v294_v54, %v298_v53 }
 0x3a6   :  { %v300_v56 = vsub.f32 %v285_v47, %v299_v55 }
 0x3a8   :  { %v301_v57 = vmul.f32 1.442695, %v300_v56 }
 0x3aa   :  { %537 = vpow2.f32 %v301_v57 }
 0x3b4   :  { %v538_v58 = vpop.eup %537 }
 0x3b5   :  { %v303_v59 = vsel %vm290_vm3, %v538_v58, 0.0  ;;  %v307_v61 = vsel %vm290_vm3, 0.0, %v538_v58 }
 0x3b6   :  { %v304_v60 = vsel %vm47_vm1, %v303_v59, 0.0  ;;  %v308_v62 = vsel %vm47_vm1, %v307_v61, 0.0 }
 0x3b7   :  { %305 = vadd.xlane.f32.xlu1 %v304_v60 }
 0x3bb   :  { %309 = vadd.xlane.f32.xlu1 %v308_v62 }
 0x3cc   :  { %391 = vperm.xlu1 %533, %v389_v8  }
 0x444   :  { %v306_v9 = vpop.xlane.xlu1 %305 }
 0x448   :  { %v310_v10 = vpop.xlane.xlu1 %309 }
 0x449   :  { %v311_v11 = vsel %vm290_vm3, %v306_v9, %v310_v10 }
 0x44a   :  { %539 = vrcp.f32 %v311_v11 }
 0x44c   :  { %v392_v15 = vpop.permute.xlu1 %391 }
 0x44d   :  { %vm393_vm5 = vcmp.eq.s32.totalorder %v392_v15, 1 }
 0x454   :  { %v540_v12 = vpop.eup %539 }
 0x455   :  { %v313_v13 = vmul.f32 %v540_v12, %v538_v58 }
 0x457   :  { %494 = vmatmul.mubr.msk.f32.vlgmr.msra.gmra.mrb[2].mxu1 %vm47_vm1, %v313_v13 }
 0x52a   :  { %v383_v0 = vpop.f32.mrb[2].mxu1 }
 0x52b   :  { %395 = vrot.lane.b32.xlu1 %v383_v0, %s546_s1  ;;  %v495_v14 = vpop.f32.mrb[3].mxu1 }
 0x52f   :  { %399 = vrot.lane.b32.xlu1 %v383_v0, %s547_s19 }
 0x59d   :  { %v396_v16 = vpop.permute.xlu1 %395 }
 0x59e   :  { %v398_v18 = vsel %vm393_vm5, %v383_v0, %v396_v16 }
 0x5a1   :  { %v400_v17 = vpop.permute.xlu1 %399 }
 0x5a2   :  { %v402_v19 = vsel %vm393_vm5, %v383_v0, %v400_v17 }
 0x5a3   :  { %v403_v20 = vsel %vm47_vm1, %v398_v18, %v402_v19 }
 0x5a4   :  { %404 = vst.msk [vmem:[%s697_s4] sm:$0xff] %vm214_vm2, %v403_v20 }

</bundles_post_ra>
